<compile_context>
chip_gen: v5e
topology: v5e:2x2
jax: 0.10.0
libtpu: 0.0.40
codegen_flags: <defaults>
</compile_context>

<pallas_src>
import jax
import jax.numpy as jnp
from jax.experimental import pallas as pl
from jax.experimental.pallas import tpu as pltpu


# ----------------------------------------------------------------------------- kernel

def _gat_resnet_block_kernel(x_ref, adjb_ref, w_ref, v_ref, out_ref):
    # x_ref:    [N, C]       node features
    # adjb_ref: [N, N] bf16  additive mask: 0 where edge j->i exists (self loops incl.), -1e30 else
    # w_ref:    [2, C, C+1]  per-layer [in, out] weight with extra column W @ att_dst
    # v_ref:    [8, C]       packed rows: as1, b1, as2, b2, gn_w, gn_b, gn_mean_scale, pad
    x = x_ref[...]
    n, c = x.shape
    adj_bias = adjb_ref[...].astype(jnp.float32)          # widen once, reused by both layers

    vp = v_ref[...]                                       # single small load, static row slices
    as1, b1 = vp[0:1, :], vp[1:2, :]
    as2, b2 = vp[2:3, :], vp[3:4, :]
    gw, gb, gms = vp[4:5, :], vp[5:6, :], vp[6:7, :]

    def leaky(v, slope):
        return jnp.maximum(v, slope * v)

    def gat_conv(h, w_ext, att_src_row, bias_row):
        # Linear (no bias) + folded att_dst column, f32 accumulation on the MXU.
        hl_ext = jnp.dot(h, w_ext, preferred_element_type=jnp.float32)     # [N, C+1]
        hl = hl_ext[:, :c]                                                 # [N, C]
        a_dst = hl_ext[:, c:c + 1]                                         # [N, 1] (free MXU col)
        # Source-node score as a lane-dense row via a trans-B matmul.
        a_src = jax.lax.dot_general(
            att_src_row, hl,
            dimension_numbers=(((1,), (1,)), ((), ())),
            preferred_element_type=jnp.float32)                            # [1, N]
        # e[i, j] = leaky_relu(a_dst[i] + a_src[j], 0.2) + additive mask.
        e = leaky(a_dst + a_src, 0.2) + adj_bias                           # [N, N]
        e = e - jnp.max(e, axis=-1, keepdims=True)
        p = jnp.exp(e)                       # masked entries underflow to exactly 0 in f32
        alpha = p / jnp.sum(p, axis=-1, keepdims=True)
        # Neighborhood aggregation + GATConv output bias.
        return jnp.dot(alpha, hl, preferred_element_type=jnp.float32) + bias_row

    def graph_norm(h):
        # Single-graph GraphNorm; single pass over h: the two reductions are independent.
        inv_n = 1.0 / n
        mean = jnp.sum(h, axis=0, keepdims=True) * inv_n                   # E[h]
        mean_sq = jnp.sum(h * h, axis=0, keepdims=True) * inv_n            # E[h^2]
        shift = mean * gms
        var = mean_sq - (2.0 * mean - shift) * shift                       # E[(h - shift)^2]
        inv_std = jax.lax.rsqrt(var + 1e-5)
        return gw * ((h - shift) * inv_std) + gb

    h = leaky(graph_norm(gat_conv(x, w_ref[0], as1, b1)), 0.01)
    h = graph_norm(gat_conv(h, w_ref[1], as2, b2))
    out_ref[...] = leaky(h + x, 0.01).astype(out_ref.dtype)


# ----------------------------------------------------------------------------- wrapper

def gat_resnet_block(x, adj_bias, kp, edge_attr=None):
    """x: [N, C] node features; adj_bias: [N, N] bf16 additive mask (0 / -1e30, self loops incl.);
    kp: packed kernel params from prepare_params(); edge_attr is ignored (edge_dim=None)."""
    del edge_attr
    N, C = x.shape
    cost = pl.CostEstimate(
        flops=2 * (2 * N * C * (C + 1) + 2 * N * N * C + 2 * N * C),  # lin+fold, alpha@hl, a_src
        transcendentals=2 * N * N,                                    # exp in the two softmaxes
        bytes_accessed=4 * (2 * N * C + 2 * C * (C + 1) + 8 * C) + 2 * N * N,
    )
    return pl.pallas_call(
        _gat_resnet_block_kernel,
        out_shape=jax.ShapeDtypeStruct((N, C), x.dtype),
        in_specs=[
            pl.BlockSpec((N, C), lambda: (0, 0)),           # x
            pl.BlockSpec((N, N), lambda: (0, 0)),           # additive adjacency bias (bf16)
            pl.BlockSpec((2, C, C + 1), lambda: (0, 0, 0)),  # stacked extended weights
            pl.BlockSpec((8, C), lambda: (0, 0)),           # packed vectors
        ],
        out_specs=pl.BlockSpec((N, C), lambda: (0, 0)),
        # Sized to actual need with headroom; comfortably under v7x's 64 MiB physical VMEM.
        compiler_params=pltpu.CompilerParams(vmem_limit_bytes=16 * 1024 * 1024),
        cost_estimate=cost,
    )(x, adj_bias, kp["w_stack"], kp["vec_pack"])


# ----------------------------------------------------------------------------- params / glue

def init_params(key, channels):
    """Deterministic synthetic parameters with PyTorch/PyG layouts."""
    ks = jax.random.split(key, 11)
    g = 1.0 / (channels ** 0.5)
    return {
        "gat1_w": jax.random.normal(ks[0], (channels, channels), jnp.float32) * g,   # [out, in]
        "gat1_att_src": jax.random.normal(ks[1], (channels,), jnp.float32) * g,
        "gat1_att_dst": jax.random.normal(ks[2], (channels,), jnp.float32) * g,
        "gat1_bias": jax.random.normal(ks[3], (channels,), jnp.float32) * 0.1,
        "gat2_w": jax.random.normal(ks[4], (channels, channels), jnp.float32) * g,   # [out, in]
        "gat2_att_src": jax.random.normal(ks[5], (channels,), jnp.float32) * g,
        "gat2_att_dst": jax.random.normal(ks[6], (channels,), jnp.float32) * g,
        "gat2_bias": jax.random.normal(ks[7], (channels,), jnp.float32) * 0.1,
        # self.norm is a single GraphNorm instance applied after BOTH GAT layers.
        "gn_weight": 1.0 + 0.1 * jax.random.normal(ks[8], (channels,), jnp.float32),
        "gn_bias": 0.1 * jax.random.normal(ks[9], (channels,), jnp.float32),
        "gn_mean_scale": 1.0 + 0.1 * jax.random.normal(ks[10], (channels,), jnp.float32),
    }


def prepare_params(p):
    """One-time layout conversion / packing, hoisted out of the per-call path:
      * [out,in] weights -> [in,out] with an extra column W @ att_dst (att_dst fold),
        stacked into a single [2, C, C+1] array;
      * the remaining seven C-length vectors packed into one sublane-padded [8, C] array."""
    C = p["gat1_w"].shape[0]
    row = lambda v: v.reshape(1, C)

    def ext(w_out_in, att_dst):
        w = w_out_in.T                                        # [in, out]
        return jnp.concatenate([w, (w @ att_dst)[:, None]], axis=1)   # [C, C+1]

    w_stack = jnp.stack([ext(p["gat1_w"], p["gat1_att_dst"]),
                         ext(p["gat2_w"], p["gat2_att_dst"])], axis=0)  # [2, C, C+1]
    vec_pack = jnp.concatenate([
        row(p["gat1_att_src"]), row(p["gat1_bias"]),
        row(p["gat2_att_src"]), row(p["gat2_bias"]),
        row(p["gn_weight"]), row(p["gn_bias"]), row(p["gn_mean_scale"]),
        jnp.zeros((1, C), jnp.float32),                        # pad to 8 sublanes
    ], axis=0)                                                 # [8, C]
    return {"w_stack": w_stack, "vec_pack": vec_pack}


def build_dense_adjacency(edge_index, num_nodes):
    """adj[i, j] = 1 iff edge j -> i exists, plus self loops (GATConv add_self_loops=True).
    Parallel duplicate edges are merged (simple-graph assumption).  Built once in plain JAX —
    the dynamic edge scatter has no clean Pallas equivalent at this scale."""
    src, dst = edge_index
    adj = jnp.zeros((num_nodes, num_nodes), jnp.float32).at[dst, src].set(1.0)
    return jnp.maximum(adj, jnp.eye(num_nodes, dtype=jnp.float32))


def adjacency_bias(adj, dtype=jnp.bfloat16):
    """Additive attention mask: 0 where an edge exists, -1e30 otherwise (bf16 halves DMA bytes)."""
    return jnp.where(adj > 0, 0.0, -1e30).astype(dtype)


# ----------------------------------------------------------------------------- reference

def gat_resnet_block_ref(x, adj, p):
    def leaky(v, s):
        return jnp.where(v > 0, v, s * v)

    def gat(h, w, a_s, a_d, b):
        hl = h @ w.T
        a_src = (hl * a_s).sum(-1)
        a_dst = (hl * a_d).sum(-1)
        e = leaky(a_dst[:, None] + a_src[None, :], 0.2)
        e = jnp.where(adj > 0, e, -1e30)
        e = e - e.max(-1, keepdims=True)
        pr = jnp.where(adj > 0, jnp.exp(e), 0.0)
        alpha = pr / pr.sum(-1, keepdims=True)
        return alpha @ hl + b

    def gnorm(h):
        mean = h.mean(0, keepdims=True)
        c = h - mean * p["gn_mean_scale"]
        var = (c * c).mean(0, keepdims=True)
        return p["gn_weight"] * c * jax.lax.rsqrt(var + 1e-5) + p["gn_bias"]

    h = leaky(gnorm(gat(x, p["gat1_w"], p["gat1_att_src"], p["gat1_att_dst"], p["gat1_bias"])), 0.01)
    h = gnorm(gat(h, p["gat2_w"], p["gat2_att_src"], p["gat2_att_dst"], p["gat2_bias"]))
    return leaky(h + x, 0.01)


# ----------------------------------------------------------------------------- demo

if __name__ == "__main__":
    key = jax.random.PRNGKey(0)
    k_x, k_e, k_p = jax.random.split(key, 3)

    N, C, E = 16, 32, 48  # nodes, channels, directed edges
    x = jax.random.normal(k_x, (N, C), jnp.float32)

    k_src, k_dst, k_attr = jax.random.split(k_e, 3)
    edge_index = jnp.stack([
        jax.random.randint(k_src, (E,), 0, N),   # source nodes
        jax.random.randint(k_dst, (E,), 0, N),   # target nodes
    ])
    edge_attr = jax.random.normal(k_attr, (E, 4), jnp.float32)  # unused (edge_dim=None)

    params = init_params(k_p, C)
    kparams = prepare_params(params)              # hoisted, one-time layout conversion / packing
    adj = build_dense_adjacency(edge_index, N)
    adj_bias = adjacency_bias(adj)                # bf16 additive mask

    out = gat_resnet_block(x, adj_bias, kparams, edge_attr)
    out = jax.block_until_ready(out)

    ref = gat_resnet_block_ref(x, adj, params)
    assert out.shape == (N, C)
    max_err = float(jnp.max(jnp.abs(out - ref)))
    assert max_err < 5e-3, max_err

    print("KERNEL_OK")
</pallas_src>

<mosaic_0001>
module attributes {stable_mosaic.version = 11 : i64} {
  func.func @_gat_resnet_block_kernel(%arg0: memref<16x32xf32, #tpu.memory_space<vmem>>, %arg1: memref<16x16xbf16, #tpu.memory_space<vmem>>, %arg2: memref<2x32x33xf32, #tpu.memory_space<vmem>>, %arg3: memref<8x32xf32, #tpu.memory_space<vmem>>, %arg4: memref<16x32xf32, #tpu.memory_space<vmem>>) attributes {dimension_semantics = [], scalar_prefetch = 0 : i64, scratch_operands = 0 : i64, tpu.core_type = #tpu.core_type<tc>} {
    %c0 = arith.constant 0 : index
    %c0_0 = arith.constant 0 : index
    %0 = vector.load %arg0[%c0, %c0_0] : memref<16x32xf32, #tpu.memory_space<vmem>>, vector<16x32xf32>
    %c0_1 = arith.constant 0 : index
    %c0_2 = arith.constant 0 : index
    %1 = vector.load %arg1[%c0_1, %c0_2] : memref<16x16xbf16, #tpu.memory_space<vmem>>, vector<16x16xbf16>
    %2 = arith.extf %1 : vector<16x16xbf16> to vector<16x16xf32>
    %c0_3 = arith.constant 0 : index
    %c0_4 = arith.constant 0 : index
    %3 = vector.load %arg3[%c0_3, %c0_4] : memref<8x32xf32, #tpu.memory_space<vmem>>, vector<8x32xf32>
    %4 = vector.extract_strided_slice %3 {offsets = [0, 0], sizes = [1, 32], strides = [1, 1]} : vector<8x32xf32> to vector<1x32xf32>
    %5 = vector.extract_strided_slice %3 {offsets = [1, 0], sizes = [1, 32], strides = [1, 1]} : vector<8x32xf32> to vector<1x32xf32>
    %6 = vector.extract_strided_slice %3 {offsets = [2, 0], sizes = [1, 32], strides = [1, 1]} : vector<8x32xf32> to vector<1x32xf32>
    %7 = vector.extract_strided_slice %3 {offsets = [3, 0], sizes = [1, 32], strides = [1, 1]} : vector<8x32xf32> to vector<1x32xf32>
    %8 = vector.extract_strided_slice %3 {offsets = [4, 0], sizes = [1, 32], strides = [1, 1]} : vector<8x32xf32> to vector<1x32xf32>
    %9 = vector.extract_strided_slice %3 {offsets = [5, 0], sizes = [1, 32], strides = [1, 1]} : vector<8x32xf32> to vector<1x32xf32>
    %10 = vector.extract_strided_slice %3 {offsets = [6, 0], sizes = [1, 32], strides = [1, 1]} : vector<8x32xf32> to vector<1x32xf32>
    %c0_5 = arith.constant 0 : index
    %c0_6 = arith.constant 0 : index
    %c0_7 = arith.constant 0 : index
    %11 = vector.load %arg2[%c0_5, %c0_6, %c0_7] : memref<2x32x33xf32, #tpu.memory_space<vmem>>, vector<1x32x33xf32>
    %12 = vector.shape_cast %11 : vector<1x32x33xf32> to vector<32x33xf32>
    %cst = arith.constant dense<0.000000e+00> : vector<16x33xf32>
    %13 = tpu.matmul %0, %12, %cst {dimension_numbers = #tpu.dot_dimension_numbers<[1], [0], [0], [1], [0, 0, 1, 1], [], []>} : vector<16x32xf32>, vector<32x33xf32>, vector<16x33xf32> -> vector<16x33xf32>
    %14 = vector.extract_strided_slice %13 {offsets = [0, 0], sizes = [16, 32], strides = [1, 1]} : vector<16x33xf32> to vector<16x32xf32>
    %15 = vector.extract_strided_slice %13 {offsets = [0, 32], sizes = [16, 1], strides = [1, 1]} : vector<16x33xf32> to vector<16x1xf32>
    %cst_8 = arith.constant dense<0.000000e+00> : vector<1x16xf32>
    %16 = tpu.matmul %4, %14, %cst_8 {dimension_numbers = #tpu.dot_dimension_numbers<[1], [1], [0], [0], [0, 0, 1, 0], [], []>} : vector<1x32xf32>, vector<16x32xf32>, vector<1x16xf32> -> vector<1x16xf32>
    %17 = vector.broadcast %15 : vector<16x1xf32> to vector<16x16xf32>
    %18 = vector.broadcast %16 : vector<1x16xf32> to vector<16x16xf32>
    %19 = arith.addf %17, %18 : vector<16x16xf32>
    %cst_9 = arith.constant 2.000000e-01 : f32
    %20 = vector.broadcast %cst_9 : f32 to vector<16x16xf32>
    %21 = arith.mulf %20, %19 : vector<16x16xf32>
    %22 = arith.maximumf %19, %21 : vector<16x16xf32>
    %23 = arith.addf %22, %2 : vector<16x16xf32>
    %cst_10 = arith.constant dense<0xFF800000> : vector<16xf32>
    %24 = vector.multi_reduction <maximumf>, %23, %cst_10 [1] : vector<16x16xf32> to vector<16xf32>
    %25 = vector.shape_cast %24 : vector<16xf32> to vector<16x1xf32>
    %26 = vector.broadcast %25 : vector<16x1xf32> to vector<16x16xf32>
    %27 = arith.subf %23, %26 : vector<16x16xf32>
    %28 = math.exp %27 : vector<16x16xf32>
    %cst_11 = arith.constant dense<0.000000e+00> : vector<16xf32>
    %29 = vector.multi_reduction <add>, %28, %cst_11 [1] : vector<16x16xf32> to vector<16xf32>
    %30 = vector.shape_cast %29 : vector<16xf32> to vector<16x1xf32>
    %31 = vector.broadcast %30 : vector<16x1xf32> to vector<16x16xf32>
    %32 = arith.divf %28, %31 : vector<16x16xf32>
    %cst_12 = arith.constant dense<0.000000e+00> : vector<16x32xf32>
    %33 = tpu.matmul %32, %14, %cst_12 {dimension_numbers = #tpu.dot_dimension_numbers<[1], [0], [0], [1], [0, 0, 1, 1], [], []>} : vector<16x16xf32>, vector<16x32xf32>, vector<16x32xf32> -> vector<16x32xf32>
    %34 = vector.broadcast %5 : vector<1x32xf32> to vector<16x32xf32>
    %35 = arith.addf %33, %34 : vector<16x32xf32>
    %cst_13 = arith.constant dense<0.000000e+00> : vector<32xf32>
    %36 = vector.multi_reduction <add>, %35, %cst_13 [0] : vector<16x32xf32> to vector<32xf32>
    %37 = vector.shape_cast %36 : vector<32xf32> to vector<1x32xf32>
    %cst_14 = arith.constant 6.250000e-02 : f32
    %38 = vector.broadcast %cst_14 : f32 to vector<1x32xf32>
    %39 = arith.mulf %37, %38 : vector<1x32xf32>
    %40 = arith.mulf %35, %35 : vector<16x32xf32>
    %cst_15 = arith.constant dense<0.000000e+00> : vector<32xf32>
    %41 = vector.multi_reduction <add>, %40, %cst_15 [0] : vector<16x32xf32> to vector<32xf32>
    %42 = vector.shape_cast %41 : vector<32xf32> to vector<1x32xf32>
    %cst_16 = arith.constant 6.250000e-02 : f32
    %43 = vector.broadcast %cst_16 : f32 to vector<1x32xf32>
    %44 = arith.mulf %42, %43 : vector<1x32xf32>
    %45 = arith.mulf %39, %10 : vector<1x32xf32>
    %cst_17 = arith.constant 2.000000e+00 : f32
    %46 = vector.broadcast %cst_17 : f32 to vector<1x32xf32>
    %47 = arith.mulf %46, %39 : vector<1x32xf32>
    %48 = arith.subf %47, %45 : vector<1x32xf32>
    %49 = arith.mulf %48, %45 : vector<1x32xf32>
    %50 = arith.subf %44, %49 : vector<1x32xf32>
    %cst_18 = arith.constant 9.99999974E-6 : f32
    %51 = vector.broadcast %cst_18 : f32 to vector<1x32xf32>
    %52 = arith.addf %50, %51 : vector<1x32xf32>
    %53 = math.rsqrt %52 : vector<1x32xf32>
    %54 = vector.broadcast %45 : vector<1x32xf32> to vector<16x32xf32>
    %55 = arith.subf %35, %54 : vector<16x32xf32>
    %56 = vector.broadcast %53 : vector<1x32xf32> to vector<16x32xf32>
    %57 = arith.mulf %55, %56 : vector<16x32xf32>
    %58 = vector.broadcast %8 : vector<1x32xf32> to vector<16x32xf32>
    %59 = arith.mulf %58, %57 : vector<16x32xf32>
    %60 = vector.broadcast %9 : vector<1x32xf32> to vector<16x32xf32>
    %61 = arith.addf %59, %60 : vector<16x32xf32>
    %cst_19 = arith.constant 0.00999999977 : f32
    %62 = vector.broadcast %cst_19 : f32 to vector<16x32xf32>
    %63 = arith.mulf %62, %61 : vector<16x32xf32>
    %64 = arith.maximumf %61, %63 : vector<16x32xf32>
    %c1 = arith.constant 1 : index
    %c0_20 = arith.constant 0 : index
    %c0_21 = arith.constant 0 : index
    %65 = vector.load %arg2[%c1, %c0_20, %c0_21] : memref<2x32x33xf32, #tpu.memory_space<vmem>>, vector<1x32x33xf32>
    %66 = vector.shape_cast %65 : vector<1x32x33xf32> to vector<32x33xf32>
    %cst_22 = arith.constant dense<0.000000e+00> : vector<16x33xf32>
    %67 = tpu.matmul %64, %66, %cst_22 {dimension_numbers = #tpu.dot_dimension_numbers<[1], [0], [0], [1], [0, 0, 1, 1], [], []>} : vector<16x32xf32>, vector<32x33xf32>, vector<16x33xf32> -> vector<16x33xf32>
    %68 = vector.extract_strided_slice %67 {offsets = [0, 0], sizes = [16, 32], strides = [1, 1]} : vector<16x33xf32> to vector<16x32xf32>
    %69 = vector.extract_strided_slice %67 {offsets = [0, 32], sizes = [16, 1], strides = [1, 1]} : vector<16x33xf32> to vector<16x1xf32>
    %cst_23 = arith.constant dense<0.000000e+00> : vector<1x16xf32>
    %70 = tpu.matmul %6, %68, %cst_23 {dimension_numbers = #tpu.dot_dimension_numbers<[1], [1], [0], [0], [0, 0, 1, 0], [], []>} : vector<1x32xf32>, vector<16x32xf32>, vector<1x16xf32> -> vector<1x16xf32>
    %71 = vector.broadcast %69 : vector<16x1xf32> to vector<16x16xf32>
    %72 = vector.broadcast %70 : vector<1x16xf32> to vector<16x16xf32>
    %73 = arith.addf %71, %72 : vector<16x16xf32>
    %cst_24 = arith.constant 2.000000e-01 : f32
    %74 = vector.broadcast %cst_24 : f32 to vector<16x16xf32>
    %75 = arith.mulf %74, %73 : vector<16x16xf32>
    %76 = arith.maximumf %73, %75 : vector<16x16xf32>
    %77 = arith.addf %76, %2 : vector<16x16xf32>
    %cst_25 = arith.constant dense<0xFF800000> : vector<16xf32>
    %78 = vector.multi_reduction <maximumf>, %77, %cst_25 [1] : vector<16x16xf32> to vector<16xf32>
    %79 = vector.shape_cast %78 : vector<16xf32> to vector<16x1xf32>
    %80 = vector.broadcast %79 : vector<16x1xf32> to vector<16x16xf32>
    %81 = arith.subf %77, %80 : vector<16x16xf32>
    %82 = math.exp %81 : vector<16x16xf32>
    %cst_26 = arith.constant dense<0.000000e+00> : vector<16xf32>
    %83 = vector.multi_reduction <add>, %82, %cst_26 [1] : vector<16x16xf32> to vector<16xf32>
    %84 = vector.shape_cast %83 : vector<16xf32> to vector<16x1xf32>
    %85 = vector.broadcast %84 : vector<16x1xf32> to vector<16x16xf32>
    %86 = arith.divf %82, %85 : vector<16x16xf32>
    %cst_27 = arith.constant dense<0.000000e+00> : vector<16x32xf32>
    %87 = tpu.matmul %86, %68, %cst_27 {dimension_numbers = #tpu.dot_dimension_numbers<[1], [0], [0], [1], [0, 0, 1, 1], [], []>} : vector<16x16xf32>, vector<16x32xf32>, vector<16x32xf32> -> vector<16x32xf32>
    %88 = vector.broadcast %7 : vector<1x32xf32> to vector<16x32xf32>
    %89 = arith.addf %87, %88 : vector<16x32xf32>
    %cst_28 = arith.constant dense<0.000000e+00> : vector<32xf32>
    %90 = vector.multi_reduction <add>, %89, %cst_28 [0] : vector<16x32xf32> to vector<32xf32>
    %91 = vector.shape_cast %90 : vector<32xf32> to vector<1x32xf32>
    %cst_29 = arith.constant 6.250000e-02 : f32
    %92 = vector.broadcast %cst_29 : f32 to vector<1x32xf32>
    %93 = arith.mulf %91, %92 : vector<1x32xf32>
    %94 = arith.mulf %89, %89 : vector<16x32xf32>
    %cst_30 = arith.constant dense<0.000000e+00> : vector<32xf32>
    %95 = vector.multi_reduction <add>, %94, %cst_30 [0] : vector<16x32xf32> to vector<32xf32>
    %96 = vector.shape_cast %95 : vector<32xf32> to vector<1x32xf32>
    %cst_31 = arith.constant 6.250000e-02 : f32
    %97 = vector.broadcast %cst_31 : f32 to vector<1x32xf32>
    %98 = arith.mulf %96, %97 : vector<1x32xf32>
    %99 = arith.mulf %93, %10 : vector<1x32xf32>
    %cst_32 = arith.constant 2.000000e+00 : f32
    %100 = vector.broadcast %cst_32 : f32 to vector<1x32xf32>
    %101 = arith.mulf %100, %93 : vector<1x32xf32>
    %102 = arith.subf %101, %99 : vector<1x32xf32>
    %103 = arith.mulf %102, %99 : vector<1x32xf32>
    %104 = arith.subf %98, %103 : vector<1x32xf32>
    %cst_33 = arith.constant 9.99999974E-6 : f32
    %105 = vector.broadcast %cst_33 : f32 to vector<1x32xf32>
    %106 = arith.addf %104, %105 : vector<1x32xf32>
    %107 = math.rsqrt %106 : vector<1x32xf32>
    %108 = vector.broadcast %99 : vector<1x32xf32> to vector<16x32xf32>
    %109 = arith.subf %89, %108 : vector<16x32xf32>
    %110 = vector.broadcast %107 : vector<1x32xf32> to vector<16x32xf32>
    %111 = arith.mulf %109, %110 : vector<16x32xf32>
    %112 = vector.broadcast %8 : vector<1x32xf32> to vector<16x32xf32>
    %113 = arith.mulf %112, %111 : vector<16x32xf32>
    %114 = vector.broadcast %9 : vector<1x32xf32> to vector<16x32xf32>
    %115 = arith.addf %113, %114 : vector<16x32xf32>
    %116 = arith.addf %115, %0 : vector<16x32xf32>
    %cst_34 = arith.constant 0.00999999977 : f32
    %117 = vector.broadcast %cst_34 : f32 to vector<16x32xf32>
    %118 = arith.mulf %117, %116 : vector<16x32xf32>
    %119 = arith.maximumf %116, %118 : vector<16x32xf32>
    %c0_35 = arith.constant 0 : index
    %c0_36 = arith.constant 0 : index
    %120 = vector.load %arg4[%c0_35, %c0_36] : memref<16x32xf32, #tpu.memory_space<vmem>>, vector<16x32xf32>
    tpu.vector_store %arg4[%c0_35, %c0_36], %119 {strides = array<i32>} : memref<16x32xf32, #tpu.memory_space<vmem>>, vector<16x32xf32>,
    return
  }
}

</mosaic_0001>

<bundles_post_ra>
// kernel: tpu_custom_call.1
= control target key start
LH: loop header
LB: loop body
LE: loop exit
PB: predicated region body
PF: predicated region fallthrough
CT: control target
= control target key end

     0   :  { %9 = vsyncpa [#allocation3], 0  ;;  %s847_s0 = inlined_call_operand.hbm [shape: f32[16,32], index: 0, kind: input, shape index: {}]   ;;  %s848_s1 = inlined_call_operand.hbm [shape: bf16[16,16], index: 1, kind: input, shape index: {}]   ;;  %s849_s2 = inlined_call_operand.hbm [shape: f32[2,32,33], index: 2, kind: input, shape index: {}]   ;;  %s850_s3 = inlined_call_operand.hbm [shape: f32[8,32], index: 3, kind: input, shape index: {}]   ;;  %s851_s4 = inlined_call_operand.hbm [shape: f32[16,32], index: 4, kind: output, shape index: {}]  }
   0x1   :  { %10 = vsyncpa [#allocation6], 0 }
   0x2   :  { %11 = vsyncpa [#allocation9], 0  ;;  %s30_s17 = sshll.u32 %s848_s1, 4  ;;  %s31_s17 = int_to_ptr.hbm [resolvable:$true] %s30_s17 }
   0x3   :  { %12 = vsyncpa [#allocation4], 0  ;;  %s714_s18 = smov [#allocation5]   ;;  %s17_s22 = sshll.u32 %s847_s0, 4  ;;  %s18_s22 = int_to_ptr.hbm [resolvable:$true] %s17_s22 }
   0x4   :  { %s32_s19 = sshll.u32 %s714_s18, 4  ;;  %s715_s23 = smov 64   ;;  %s33_s19 = int_to_ptr.vmem [resolvable:$true] %s32_s19 }
   0x5   :  { %s716_s24 = smov 4   ;;  %s717_s25 = smov [#allocation2]  }
   0x6   :  { %38 = dma.hbm_to_vmem [thread:$0]  %s31_s17, 128, %s33_s19, [#allocation6], %s715_s23, %s715_s23, %s716_s24  }
   0x7   :  { %s19_s26 = sshll.u32 %s717_s25, 4  ;;  %s718_s27 = smov 128   ;;  %s20_s26 = int_to_ptr.vmem [resolvable:$true] %s19_s26 }
   0x8   :  { %s719_s28 = smov 8   ;;  %s43_s30 = sshll.u32 %s849_s2, 4  ;;  %s44_s30 = int_to_ptr.hbm [resolvable:$true] %s43_s30 }
   0x9   :  { %25 = dma.hbm_to_vmem [thread:$0]  %s18_s22, 256, %s20_s26, [#allocation3], %s718_s27, %s718_s27, %s719_s28  }
   0xa   :  { %s720_s5 = smov [#allocation7]   ;;  %s57_s8 = sshll.u32 %s850_s3, 4  ;;  %s58_s8 = int_to_ptr.hbm [resolvable:$true] %s57_s8 }
   0xb   :  { %s45_s0 = sshll.u32 %s720_s5, 4  ;;  %s721_s9 = smov [#allocation8]   ;;  %s46_s0 = int_to_ptr.vmem [resolvable:$true] %s45_s0 }
   0xc   :  { %51 = dma.hbm_to_vmem [thread:$0]  %s44_s30, 1024, %s46_s0, [#allocation6], %s718_s27, %s718_s27, %s719_s28  }
   0xd   :  { %s59_s10 = sshll.u32 %s721_s9, 4  ;;  %s60_s10 = int_to_ptr.vmem [resolvable:$true] %s59_s10 }
   0xe   :  { %62 = dma.hbm_to_vmem [thread:$0]  %s58_s8, 128, %s60_s10, [#allocation9]  }
   0xf   :  { %706 = dma.done.wait [#allocation3], 256  }
  0x10   :  { %707 = vsyncadd [#allocation3], 4294967040 }
  0x11   :  { %708 = dma.done.wait [#allocation6], 1152  }
  0x12   :  { %709 = vsyncadd [#allocation6], 4294966144 }
  0x13   :  { %710 = dma.done.wait [#allocation9], 128  }
  0x14   :  { %711 = vsyncadd [#allocation9], 4294967168  ;;  %v89_v0 = vld [vmem:[#allocation7 + $0x18] sm:$0xff]  ;;  %v88_v1 = vld [vmem:[#allocation7 + $0x10] sm:$0xff]  ;;  %vm90_vm0 = vcmask 261120   ;;  %v722_v6 = vmov 32  }
  0x15   :  { %109 = vmatpush.msra.mxu0 %v89_v0  ;;  %v87_v2 = vld [vmem:[#allocation7 + $0x8] sm:$0xff]  ;;  %v86_v3 = vld [vmem:[#allocation7] sm:$0xff]  ;;  %v771_v5 = vld [vmem:[#allocation2 + $0x8] sm:$0xff]  ;;  %564 = vset.pattern.permute.xlu0 %v722_v6  ;;  %vm166_vm1 = vcmask 130048   ;;  %s723_s2 = smov [#allocation10]   ;;  %s519_s13 = sshll.u32 %s851_s4, 4  ;;  %s520_s13 = int_to_ptr.hbm [resolvable:$true] %s519_s13 }
  0x16   :  { %v767_v4 = vld [vmem:[#allocation2] sm:$0xff]  ;;  %565 = vset.pattern.permute.xlu1 %v722_v6  ;;  %v777_v9 = vld [vmem:[#allocation8] sm:$0xff]  ;;  %v781_v14 = vld [vmem:[#allocation5] sm:$0xff]   ;;  %s517_s3 = sshll.u32 %s723_s2, 4  ;;  %s518_s3 = int_to_ptr.vmem [resolvable:$true] %s517_s3 }
  0x17   :  { %110 = vmatpush.msra.mxu0 %v88_v1  ;;  %v551_v18 = vunpack.c.h.bf16 %v781_v14  ;;  %v550_v23 = vunpack.c.l.bf16 %v781_v14  ;;  %v215_v61 = vperm.slane %v777_v9, 1 }
  0x19   :  { %111 = vmatpush.msra.mxu0 %v87_v2 }
  0x1b   :  { %112 = vmatpush.msra.mxu0 %v86_v3 }
  0x1c   :  { %534 = vmatmul.msk.f32.vlgmr.msra.gmra.mxu0 %vm90_vm0, %v767_v4 }
  0x24   :  { %535 = vmatmul.msk.f32.gmra.mxu0 %vm90_vm0, %v771_v5 }
  0x99   :  { %v114_v7 = vpop.f32.mrf.mxu0 }
  0xa1   :  { %v117_v8 = vpop.f32.mrf.mxu0 }
  0xa2   :  { %154 = vperm.xlu0 %564, %v117_v8   ;;  %536 = vmatpush.xpose.msk.msra.mxu1 %vm90_vm0, %v117_v8 }
  0xa3   :  { %236 = vmatpush.msrb.mxu0 %v117_v8  ;;  %552 = vmatpush.msra.mxu2 %v117_v8 }
  0xa5   :  { %237 = vmatpush.msrb.mxu0 %v114_v7  ;;  %553 = vmatpush.msra.mxu2 %v114_v7 }
  0xa6   :  { %537 = vmatpush.xpose.msk.msra.mxu1 %vm90_vm0, %v114_v7 }
  0xa9   :  { %538 = vmatmul.msk.f32.vlgmr.msra.gmra.mxu1 %vm90_vm0, %v777_v9 }
  0xaa   :  { %150 = vperm.xlu0 %564, %v114_v7  }
 0x114   :  { %v155_v10 = vpop.permute.xlu0 %154 }
 0x11c   :  { %v151_v13 = vpop.permute.xlu0 %150 }
 0x126   :  { %v146_v11 = vpop.f32.mrf.mxu1 }
 0x127   :  { %v157_v12 = vperm.slane %v146_v11, 0 }
 0x129   :  { %v158_v15 = vadd.f32 %v157_v12, %v151_v13  ;;  %v159_v16 = vadd.f32 %v157_v12, %v155_v10 }
 0x12b   :  { %v161_v17 = vmul.f32 0.2, %v159_v16  ;;  %v160_v19 = vmul.f32 0.2, %v158_v15 }
 0x12d   :  { %v163_v20 = vmax.f32 %v159_v16, %v161_v17  ;;  %v162_v24 = vmax.f32 %v158_v15, %v160_v19 }
 0x12f   :  { %v165_v21 = vadd.f32 %v551_v18, %v163_v20  ;;  %v164_v25 = vadd.f32 %v550_v23, %v162_v24 }
 0x131   :  { %v170_v22 = vsel %vm166_vm1, %v165_v21, -inf  ;;  %v167_v26 = vsel %vm166_vm1, %v164_v25, -inf }
 0x132   :  { %171 = vmax.xlane.f32.xlu1 %v170_v22 }
 0x13a   :  { %168 = vmax.xlane.f32.xlu1 %v167_v26 }
 0x1a5   :  { %v172_v27 = vpop.xlane.xlu1 %171 }
 0x1a6   :  { %v174_v28 = vsub.f32 %v165_v21, %v172_v27 }
 0x1a8   :  { %v177_v29 = vmul.f32 1.442695, %v174_v28  ;;  %v303_v28 = vld [vmem:[#allocation7 + $0x38] sm:$0xff] }
 0x1a9   :  { %322 = vmatpush.msra.mxu3 %v303_v28 }
 0x1aa   :  { %566 = vpow2.f32 %v177_v29  ;;  %v302_v29 = vld [vmem:[#allocation7 + $0x30] sm:$0xff] }
 0x1ab   :  { %323 = vmatpush.msra.mxu3 %v302_v29 }
 0x1ad   :  { %v169_v30 = vpop.xlane.xlu1 %168 }
 0x1ae   :  { %v173_v31 = vsub.f32 %v164_v25, %v169_v30 }
 0x1b0   :  { %v567_v32 = vpop.eup %566  ;;  %v175_v33 = vmul.f32 1.442695, %v173_v31 }
 0x1b1   :  { %v182_v34 = vsel %vm166_vm1, %v567_v32, 0.0 }
 0x1b2   :  { %568 = vpow2.f32 %v175_v33  ;;  %183 = vadd.xlane.f32.xlu2 %v182_v34  ;;  %v301_v33 = vld [vmem:[#allocation7 + $0x28] sm:$0xff] }
 0x1b3   :  { %324 = vmatpush.msra.mxu3 %v301_v33 }
 0x1b8   :  { %v569_v35 = vpop.eup %568 }
 0x1b9   :  { %v179_v36 = vsel %vm166_vm1, %v569_v35, 0.0 }
 0x1ba   :  { %180 = vadd.xlane.f32.xlu2 %v179_v36 }
 0x225   :  { %v184_v37 = vpop.xlane.xlu2 %183 }
 0x226   :  { %570 = vrcp.f32 %v184_v37  ;;  %v211_v42 = vand.u32 2147483648, %v184_v37  ;;  %v209_v44 = vand.u32 2147483647, %v184_v37  ;;  %vm205_vm3 = vweird.f32 %v184_v37 }
 0x228   :  { %v212_v47 = vor.u32 1.1754944e-38, %v211_v42  ;;  %vm210_vm5 = vcmp.eq.f32.partialorder %v209_v44, 8.507059e+37 }
 0x22c   :  { %v571_v38 = vpop.eup %570 }
 0x22d   :  { %v201_v39 = vmul.f32 %v571_v38, %v184_v37  ;;  %v181_v40 = vpop.xlane.xlu2 %180  ;;  %vm206_vm2 = vweird.f32 %v571_v38 }
 0x22e   :  { %572 = vrcp.f32 %v181_v40  ;;  %vm207_vm4 = vmor %vm205_vm3, %vm206_vm2  ;;  %v196_v53 = vand.u32 2147483648, %v181_v40  ;;  %v194_v55 = vand.u32 2147483647, %v181_v40  ;;  %vm190_vm7 = vweird.f32 %v181_v40 }
 0x22f   :  { %v202_v41 = vsub.f32 1.0, %v201_v39 }
 0x230   :  { %v197_v57 = vor.u32 1.1754944e-38, %v196_v53  ;;  %vm195_vm9 = vcmp.eq.f32.partialorder %v194_v55, 8.507059e+37  ;;  %v805_v53 = vperm.slane %v777_v9, 5 }
 0x231   :  { %v203_v43 = vmul.f32 %v571_v38, %v202_v41 }
 0x233   :  { %v204_v45 = vadd.f32 %v571_v38, %v203_v43 }
 0x234   :  { %v573_v46 = vpop.eup %572 }
 0x235   :  { %v186_v48 = vmul.f32 %v573_v46, %v181_v40  ;;  %v208_v49 = vsel %vm207_vm4, %v571_v38, %v204_v45  ;;  %vm191_vm6 = vweird.f32 %v573_v46 }
 0x236   :  { %v213_v50 = vsel %vm210_vm5, %v212_v47, %v208_v49  ;;  %vm192_vm8 = vmor %vm190_vm7, %vm191_vm6 }
 0x237   :  { %v187_v51 = vsub.f32 1.0, %v186_v48  ;;  %v214_v52 = vmul.f32 %v567_v32, %v213_v50 }
 0x239   :  { %v188_v54 = vmul.f32 %v573_v46, %v187_v51  ;;  %540 = vmatmul.msk.f32.vlgmr.msra.gmra.mxu2 %vm166_vm1, %v214_v52  ;;  %v802_v51 = vperm.slane %v777_v9, 4 }
 0x23b   :  { %v189_v56 = vadd.f32 %v573_v46, %v188_v54 }
 0x23d   :  { %v193_v58 = vsel %vm192_vm8, %v573_v46, %v189_v56 }
 0x23e   :  { %v198_v59 = vsel %vm195_vm9, %v197_v57, %v193_v58 }
 0x23f   :  { %v199_v60 = vmul.f32 %v569_v35, %v198_v59  ;;  %v300_v35 = vld [vmem:[#allocation7 + $0x20] sm:$0xff] }
 0x240   :  { %325 = vmatpush.msra.mxu3 %v300_v35 }
 0x241   :  { %539 = vmatmul.msk.f32.vlgmr.msrb.gmra.mxu0 %vm166_vm1, %v199_v60 }
 0x2bc   :  { %v242_v62 = vpop.f32.mrf.mxu2 }
 0x2bd   :  { %v243_v63 = vadd.f32 %v242_v62, %v215_v61 }
 0x2be   :  { %v239_v0 = vpop.f32.mrf.mxu0 }
 0x2bf   :  { %v256_v1 = vmul.f32 %v243_v63, %v243_v63  ;;  %v240_v2 = vadd.f32 %v239_v0, %v215_v61  ;;  %v246_v3 = vsel %vm90_vm0, %v243_v63, 0.0 }
 0x2c1   :  { %v245_v6 = vsel %vm90_vm0, %v240_v2, 0.0  ;;  %v255_v7 = vmul.f32 %v240_v2, %v240_v2  ;;  %v258_v10 = vsel %vm90_vm0, %v256_v1, 0.0  ;;  %v333_v1 = vrot.slane %v777_v9, 2 }
 0x2c2   :  { %v247_v8 = vadd.f32 %v246_v3, %v245_v6 }
 0x2c3   :  { %v257_v11 = vsel %vm90_vm0, %v255_v7, 0.0 }
 0x2c4   :  { %v248_v12 = vrot.slane %v247_v8, 4  ;;  %v259_v13 = vadd.f32 %v258_v10, %v257_v11 }
 0x2c6   :  { %v249_v15 = vadd.f32 %v248_v12, %v247_v8  ;;  %v260_v16 = vrot.slane %v259_v13, 4 }
 0x2c8   :  { %v250_v17 = vrot.slane %v249_v15, 2  ;;  %v261_v19 = vadd.f32 %v260_v16, %v259_v13 }
 0x2ca   :  { %v251_v20 = vadd.f32 %v250_v17, %v249_v15  ;;  %v262_v21 = vrot.slane %v261_v19, 2 }
 0x2cc   :  { %v252_v22 = vrot.slane %v251_v20, 1  ;;  %v263_v24 = vadd.f32 %v262_v21, %v261_v19 }
 0x2ce   :  { %v253_v25 = vadd.f32 %v252_v22, %v251_v20  ;;  %v264_v26 = vrot.slane %v263_v24, 1 }
 0x2d0   :  { %v254_v27 = vmul.f32 0.0625, %v253_v25  ;;  %v265_v30 = vadd.f32 %v264_v26, %v263_v24 }
 0x2d2   :  { %v267_v31 = vmul.f32 %v254_v27, %v777_v9  ;;  %v268_v32 = vmul.f32 2.0, %v254_v27  ;;  %v266_v36 = vmul.f32 0.0625, %v265_v30 }
 0x2d4   :  { %v269_v34 = vsub.f32 %v268_v32, %v267_v31  ;;  %v283_v45 = vperm.slane %v267_v31, 6 }
 0x2d6   :  { %v270_v37 = vmul.f32 %v269_v34, %v267_v31  ;;  %v284_v48 = vsub.f32 %v240_v2, %v283_v45  ;;  %v285_v49 = vsub.f32 %v243_v63, %v283_v45 }
 0x2d8   :  { %v271_v38 = vsub.f32 %v266_v36, %v270_v37 }
 0x2da   :  { %v272_v39 = vadd.f32 1e-05, %v271_v38 }
 0x2dc   :  { %574 = vrsqrt.f32 %v272_v39  ;;  %vm279_vm11 = vweird.f32 %v272_v39 }
 0x2e2   :  { %v575_v40 = vpop.eup %574 }
 0x2e3   :  { %v274_v41 = vmul.f32 %v575_v40, %v272_v39  ;;  %vm280_vm10 = vweird.f32 %v575_v40 }
 0x2e4   :  { %vm281_vm12 = vmor %vm279_vm11, %vm280_vm10 }
 0x2e5   :  { %v275_v42 = vmul.f32 %v575_v40, %v274_v41 }
 0x2e7   :  { %v276_v43 = vmul.f32 0.5, %v275_v42 }
 0x2e9   :  { %v277_v44 = vsub.f32 1.5, %v276_v43 }
 0x2eb   :  { %v278_v46 = vmul.f32 %v575_v40, %v277_v44 }
 0x2ed   :  { %v282_v47 = vsel %vm281_vm12, %v575_v40, %v278_v46 }
 0x2ee   :  { %v286_v50 = vperm.slane %v282_v47, 6 }
 0x2f0   :  { %v287_v52 = vmul.f32 %v286_v50, %v284_v48  ;;  %v288_v54 = vmul.f32 %v286_v50, %v285_v49 }
 0x2f2   :  { %v290_v55 = vmul.f32 %v802_v51, %v287_v52  ;;  %v291_v57 = vmul.f32 %v802_v51, %v288_v54 }
 0x2f4   :  { %v293_v56 = vadd.f32 %v805_v53, %v290_v55  ;;  %v294_v60 = vadd.f32 %v805_v53, %v291_v57 }
 0x2f6   :  { %v295_v58 = vmul.f32 0.01, %v293_v56  ;;  %v296_v61 = vmul.f32 0.01, %v294_v60 }
 0x2f8   :  { %v297_v59 = vmax.f32 %v293_v56, %v295_v58  ;;  %v298_v62 = vmax.f32 %v294_v60, %v296_v61  ;;  %v427_v56 = vperm.slane %v777_v9, 3 }
 0x2fa   :  { %541 = vmatmul.msk.f32.vlgmr.msra.gmra.mxu3 %vm90_vm0, %v297_v59 }
 0x302   :  { %542 = vmatmul.msk.f32.gmra.mxu3 %vm90_vm0, %v298_v62 }
 0x37d   :  { %v327_v63 = vpop.f32.mrf.mxu3 }
 0x37e   :  { %363 = vperm.xlu0 %564, %v327_v63  }
 0x385   :  { %v330_v0 = vpop.f32.mrf.mxu3 }
 0x386   :  { %367 = vperm.xlu1 %565, %v330_v0   ;;  %543 = vmatpush.xpose.msk.msrb.mxu1 %vm90_vm0, %v330_v0 }
 0x387   :  { %448 = vmatpush.msrb.mxu2 %v330_v0 }
 0x389   :  { %449 = vmatpush.msrb.mxu2 %v327_v63 }
 0x38a   :  { %544 = vmatpush.xpose.msk.msrb.mxu1 %vm90_vm0, %v327_v63 }
 0x38d   :  { %545 = vmatmul.msk.f32.vlgmr.msrb.gmra.mxu1 %vm90_vm0, %v333_v1 }
 0x3f0   :  { %v364_v6 = vpop.permute.xlu0 %363 }
 0x3f8   :  { %v368_v7 = vpop.permute.xlu1 %367 }
 0x40a   :  { %v359_v2 = vpop.f32.mrf.mxu1 }
 0x40b   :  { %v370_v3 = vperm.slane %v359_v2, 0 }
 0x40d   :  { %v371_v8 = vadd.f32 %v370_v3, %v364_v6  ;;  %v372_v10 = vadd.f32 %v370_v3, %v368_v7 }
 0x40f   :  { %v373_v11 = vmul.f32 0.2, %v371_v8  ;;  %v374_v12 = vmul.f32 0.2, %v372_v10 }
 0x411   :  { %v375_v13 = vmax.f32 %v371_v8, %v373_v11  ;;  %v376_v15 = vmax.f32 %v372_v10, %v374_v12 }
 0x413   :  { %v378_v16 = vadd.f32 %v551_v18, %v376_v15  ;;  %v377_v17 = vadd.f32 %v550_v23, %v375_v13 }
 0x415   :  { %v382_v19 = vsel %vm166_vm1, %v378_v16, -inf  ;;  %v379_v20 = vsel %vm166_vm1, %v377_v17, -inf }
 0x416   :  { %383 = vmax.xlane.f32.xlu0 %v382_v19  ;;  %380 = vmax.xlane.f32.xlu2 %v379_v20 }
 0x489   :  { %v381_v21 = vpop.xlane.xlu2 %380  ;;  %v384_v22 = vpop.xlane.xlu0 %383 }
 0x48a   :  { %v385_v24 = vsub.f32 %v377_v17, %v381_v21  ;;  %v386_v26 = vsub.f32 %v378_v16, %v384_v22 }
 0x48c   :  { %v387_v25 = vmul.f32 1.442695, %v385_v24  ;;  %v389_v27 = vmul.f32 1.442695, %v386_v26 }
 0x48e   :  { %576 = vpow2.f32 %v387_v25 }
 0x48f   :  { %578 = vpow2.f32 %v389_v27 }
 0x494   :  { %v577_v28 = vpop.eup %576 }
 0x495   :  { %v391_v18 = vsel %vm166_vm1, %v577_v28, 0.0  ;;  %v579_v14 = vpop.eup %578 }
 0x496   :  { %392 = vadd.xlane.f32.xlu2 %v391_v18  ;;  %v394_v23 = vsel %vm166_vm1, %v579_v14, 0.0 }
 0x49e   :  { %395 = vadd.xlane.f32.xlu2 %v394_v23 }
 0x509   :  { %v393_v29 = vpop.xlane.xlu2 %392 }
 0x50a   :  { %580 = vrcp.f32 %v393_v29  ;;  %v408_v34 = vand.u32 2147483648, %v393_v29  ;;  %v406_v36 = vand.u32 2147483647, %v393_v29  ;;  %vm402_vm14 = vweird.f32 %v393_v29 }
 0x50c   :  { %v409_v39 = vor.u32 1.1754944e-38, %v408_v34  ;;  %vm407_vm2 = vcmp.eq.f32.partialorder %v406_v36, 8.507059e+37 }
 0x510   :  { %v581_v30 = vpop.eup %580 }
 0x511   :  { %v398_v31 = vmul.f32 %v581_v30, %v393_v29  ;;  %v396_v32 = vpop.xlane.xlu2 %395  ;;  %vm403_vm13 = vweird.f32 %v581_v30 }
 0x512   :  { %582 = vrcp.f32 %v396_v32  ;;  %vm404_vm15 = vmor %vm402_vm14, %vm403_vm13  ;;  %v423_v45 = vand.u32 2147483648, %v396_v32  ;;  %v421_v47 = vand.u32 2147483647, %v396_v32  ;;  %vm417_vm4 = vweird.f32 %v396_v32 }
 0x513   :  { %v399_v33 = vsub.f32 1.0, %v398_v31 }
 0x514   :  { %v424_v49 = vor.u32 1.1754944e-38, %v423_v45  ;;  %vm422_vm6 = vcmp.eq.f32.partialorder %v421_v47, 8.507059e+37 }
 0x515   :  { %v400_v35 = vmul.f32 %v581_v30, %v399_v33 }
 0x517   :  { %v401_v37 = vadd.f32 %v581_v30, %v400_v35 }
 0x518   :  { %v583_v38 = vpop.eup %582 }
 0x519   :  { %v413_v40 = vmul.f32 %v583_v38, %v396_v32  ;;  %v405_v41 = vsel %vm404_vm15, %v581_v30, %v401_v37  ;;  %vm418_vm3 = vweird.f32 %v583_v38 }
 0x51a   :  { %v410_v42 = vsel %vm407_vm2, %v409_v39, %v405_v41  ;;  %vm419_vm5 = vmor %vm417_vm4, %vm418_vm3 }
 0x51b   :  { %v414_v43 = vsub.f32 1.0, %v413_v40  ;;  %v411_v44 = vmul.f32 %v577_v28, %v410_v42 }
 0x51d   :  { %v415_v46 = vmul.f32 %v583_v38, %v414_v43  ;;  %546 = vmatmul.msk.f32.vlgmr.msrb.gmra.mxu2 %vm166_vm1, %v411_v44 }
 0x51f   :  { %v416_v48 = vadd.f32 %v583_v38, %v415_v46 }
 0x521   :  { %v420_v50 = vsel %vm419_vm5, %v583_v38, %v416_v48 }
 0x522   :  { %v425_v52 = vsel %vm422_vm6, %v424_v49, %v420_v50 }
 0x523   :  { %v426_v54 = vmul.f32 %v579_v14, %v425_v52 }
 0x525   :  { %547 = vmatmul.msk.f32.gmra.mxu2 %vm166_vm1, %v426_v54 }
 0x5a0   :  { %v451_v55 = vpop.f32.mrf.mxu2 }
 0x5a1   :  { %v452_v57 = vadd.f32 %v451_v55, %v427_v56 }
 0x5a3   :  { %v467_v59 = vmul.f32 %v452_v57, %v452_v57  ;;  %v457_v61 = vsel %vm90_vm0, %v452_v57, 0.0 }
 0x5a5   :  { %v469_v1 = vsel %vm90_vm0, %v467_v59, 0.0 }
 0x5a8   :  { %v454_v58 = vpop.f32.mrf.mxu2 }
 0x5a9   :  { %v455_v60 = vadd.f32 %v454_v58, %v427_v56 }
 0x5ab   :  { %v458_v62 = vsel %vm90_vm0, %v455_v60, 0.0  ;;  %v468_v63 = vmul.f32 %v455_v60, %v455_v60 }
 0x5ac   :  { %v459_v0 = vadd.f32 %v458_v62, %v457_v61 }
 0x5ad   :  { %v470_v2 = vsel %vm90_vm0, %v468_v63, 0.0 }
 0x5ae   :  { %v460_v3 = vrot.slane %v459_v0, 4  ;;  %v471_v6 = vadd.f32 %v470_v2, %v469_v1 }
 0x5b0   :  { %v461_v7 = vadd.f32 %v460_v3, %v459_v0  ;;  %v472_v8 = vrot.slane %v471_v6, 4 }
 0x5b2   :  { %v462_v10 = vrot.slane %v461_v7, 2  ;;  %v473_v11 = vadd.f32 %v472_v8, %v471_v6 }
 0x5b4   :  { %v463_v12 = vadd.f32 %v462_v10, %v461_v7  ;;  %v474_v13 = vrot.slane %v473_v11, 2 }
 0x5b6   :  { %v464_v15 = vrot.slane %v463_v12, 1  ;;  %v475_v16 = vadd.f32 %v474_v13, %v473_v11 }
 0x5b8   :  { %v465_v17 = vadd.f32 %v464_v15, %v463_v12  ;;  %v476_v19 = vrot.slane %v475_v16, 1 }
 0x5ba   :  { %v466_v20 = vmul.f32 0.0625, %v465_v17  ;;  %v477_v21 = vadd.f32 %v476_v19, %v475_v16 }
 0x5bc   :  { %v479_v22 = vmul.f32 %v466_v20, %v777_v9  ;;  %v480_v24 = vmul.f32 2.0, %v466_v20  ;;  %v478_v26 = vmul.f32 0.0625, %v477_v21 }
 0x5be   :  { %v481_v25 = vsub.f32 %v480_v24, %v479_v22  ;;  %v495_v32 = vperm.slane %v479_v22, 6 }
 0x5c0   :  { %v482_v27 = vmul.f32 %v481_v25, %v479_v22  ;;  %v496_v35 = vsub.f32 %v452_v57, %v495_v32  ;;  %v497_v9 = vsub.f32 %v455_v60, %v495_v32 }
 0x5c2   :  { %v483_v28 = vsub.f32 %v478_v26, %v482_v27 }
 0x5c4   :  { %v484_v18 = vadd.f32 1e-05, %v483_v28 }
 0x5c6   :  { %584 = vrsqrt.f32 %v484_v18  ;;  %vm491_vm7 = vweird.f32 %v484_v18 }
 0x5cc   :  { %v585_v14 = vpop.eup %584 }
 0x5cd   :  { %v486_v23 = vmul.f32 %v585_v14, %v484_v18  ;;  %vm492_vm1 = vweird.f32 %v585_v14 }
 0x5ce   :  { %vm493_vm8 = vmor %vm491_vm7, %vm492_vm1 }
 0x5cf   :  { %v487_v29 = vmul.f32 %v585_v14, %v486_v23 }
 0x5d1   :  { %v488_v30 = vmul.f32 0.5, %v487_v29 }
 0x5d3   :  { %v489_v31 = vsub.f32 1.5, %v488_v30 }
 0x5d5   :  { %v490_v33 = vmul.f32 %v585_v14, %v489_v31 }
 0x5d7   :  { %v494_v34 = vsel %vm493_vm8, %v585_v14, %v490_v33 }
 0x5d8   :  { %v498_v36 = vperm.slane %v494_v34, 6 }
 0x5da   :  { %v499_v37 = vmul.f32 %v498_v36, %v496_v35  ;;  %v500_v38 = vmul.f32 %v498_v36, %v497_v9 }
 0x5dc   :  { %v501_v39 = vmul.f32 %v499_v37, %v802_v51  ;;  %v502_v40 = vmul.f32 %v500_v38, %v802_v51 }
 0x5de   :  { %v504_v41 = vadd.f32 %v502_v40, %v805_v53  ;;  %v503_v42 = vadd.f32 %v501_v39, %v805_v53 }
 0x5e0   :  { %v505_v43 = vadd.f32 %v503_v42, %v767_v4  ;;  %v506_v44 = vadd.f32 %v504_v41, %v771_v5 }
 0x5e2   :  { %v507_v45 = vmul.f32 0.01, %v505_v43  ;;  %v508_v46 = vmul.f32 0.01, %v506_v44 }
 0x5e4   :  { %v509_v47 = vmax.f32 %v505_v43, %v507_v45  ;;  %v510_v48 = vmax.f32 %v506_v44, %v508_v46 }
 0x5e6   :  { %511 = vst.msk [vmem:[#allocation10] sm:$0xff] %vm90_vm0, %v509_v47 }
 0x5e7   :  { %512 = vst.msk [vmem:[#allocation10 + $0x8] sm:$0xff] %vm90_vm0, %v510_v48 }
 0x5e8   :  { %525 = dma.vmem_to_hbm [thread:$0]  %s518_s3, 256, %s520_s13, [#allocation4], %s718_s27, %s718_s27, %s719_s28  }
 0x5e9   :  { %712 = dma.done.wait [#allocation4], 256  }
 0x5ea   :  { %713 = vsyncadd [#allocation4], 4294967040 }
 0x5eb   :  { %530 = vsyncpa [#allocation3], 1 }
 0x5ec   :  { %531 = vsyncpa [#allocation6], 1 }
 0x5ed   :  { %532 = vsyncpa [#allocation9], 1 }
 0x5ee   :  { %533 = vsyncpa [#allocation4], 1 }

</bundles_post_ra>
